<compile_context>
chip_gen: v5e
topology: v5e:2x2
jax: 0.10.0
libtpu: 0.0.40
codegen_flags: <defaults>
</compile_context>

<pallas_src>
import jax
import jax.numpy as jnp
from jax import lax
from jax.experimental import pallas as pl
from jax.experimental.pallas import tpu as pltpu


def xaint_kernel(x_ref, w1_ref, b1_ref, w2_ref, b2_ref, wac_ref, bac_ref, o_ref):
    cdt = w2_ref.dtype  # streaming / MXU dtype for the wide layers

    # truncated_model layer 1: Linear(8,64) + ReLU.
    # x arrives in its natural (TB, F) layout; contract its last (feature) dim
    # so the result is already batch-on-lanes: (64, TB).
    h = lax.dot_general(
        w1_ref[...], x_ref[...],
        dimension_numbers=(((1,), (1,)), ((), ())),
        preferred_element_type=jnp.float32)
    h = jnp.maximum(h + b1_ref[...], 0.0).astype(cdt)

    # truncated_model layer 2: Linear(64,32) + ReLU (batch on lanes).
    h = jnp.dot(w2_ref[...], h, preferred_element_type=jnp.float32)
    h = jnp.maximum(h + b2_ref[...], 0.0).astype(cdt)

    # fused adjust_layer + classifier: Linear(32, out_dim).
    y = jnp.dot(wac_ref[...], h, preferred_element_type=jnp.float32)
    o_ref[...] = (y + bac_ref[...]).astype(o_ref.dtype)


def _round_up(n, m):
    return ((n + m - 1) // m) * m


def xaint_forward(x, params, *, tb=8192, stream_dtype=jnp.float32):
    """XAINT forward.

    x: (B, in_features) f32.
    params: ((w,b), ...) for (truncated layer 1, truncated layer 2,
             adjust_layer, classifier); w is (in, out), b is (1, out).
    tb: batch tile (lanes) per grid step; sweep 4096-16384 for peak throughput.
    stream_dtype: dtype x / weights are streamed in (f32 or bf16); accumulation
                  stays f32.
    """
    (w1, b1), (w2, b2), (wa, ba), (wc, bc) = params
    B, F = x.shape
    out_dim = wc.shape[1]

    # Exact algebraic fusion of adjust_layer + classifier (no activation between).
    wac = wa @ wc                       # (32, out_dim)
    bac = ba @ wc + bc                  # (1, out_dim)

    # Output-major weights so the kernel keeps the batch on the lane axis.
    x_s = x.astype(stream_dtype)
    w1T = w1.T.astype(stream_dtype)     # (64, 8)
    w2T = w2.T.astype(stream_dtype)     # (32, 64)
    wacT = wac.T.astype(stream_dtype)   # (out_dim, 32)
    b1T = b1.T.astype(jnp.float32)      # (64, 1)   biases stay f32 (tiny)
    b2T = b2.T.astype(jnp.float32)      # (32, 1)
    bacT = bac.T.astype(jnp.float32)    # (out_dim, 1)

    # Batch tile: large enough to amortize the ~0.35us/step overhead and make the
    # per-step DMAs efficient, but capped at ceil(B/2) so large batches keep >=2
    # grid steps (both v7x TensorCores engage on the "parallel" axis).
    tb_eff = max(128, min(_round_up(tb, 128), _round_up(pl.cdiv(B, 2), 128)))
    grid = (pl.cdiv(B, tb_eff),)        # ragged tail masked by Pallas

    def resident(shape):
        # Same block every grid step -> stays VMEM-resident, DMA'd once.
        return pl.BlockSpec(shape, lambda i: (0, 0))

    itemsize = x_s.dtype.itemsize
    flops = 2 * B * (F * w1.shape[1] + w1.shape[1] * w2.shape[1]
                     + w2.shape[1] * out_dim)
    bytes_accessed = (itemsize * (B * F + w1T.size + w2T.size + wacT.size)
                      + 4 * (B * out_dim + b1T.size + b2T.size + bacT.size))

    outT = pl.pallas_call(
        xaint_kernel,
        out_shape=jax.ShapeDtypeStruct((out_dim, B), jnp.float32),
        grid_spec=pltpu.PrefetchScalarGridSpec(
            num_scalar_prefetch=0,
            grid=grid,
            in_specs=[
                # x streams through the grid in its natural (B, F) layout.
                pl.BlockSpec((tb_eff, F), lambda i: (i, 0)),
                resident(w1T.shape), resident(b1T.shape),
                resident(w2T.shape), resident(b2T.shape),
                resident(wacT.shape), resident(bacT.shape),
            ],
            # Batch-on-lanes output -> lane-dense, unmasked stores.
            out_specs=pl.BlockSpec((out_dim, tb_eff), lambda i: (0, i)),
        ),
        compiler_params=pltpu.CompilerParams(
            dimension_semantics=("parallel",),
            vmem_limit_bytes=48 * 1024 * 1024),
        cost_estimate=pl.CostEstimate(
            flops=flops, transcendentals=0, bytes_accessed=bytes_accessed),
    )(x_s, w1T, b1T, w2T, b2T, wacT, bacT)

    return outT.T                       # (B, out_dim); (1,B)->(B,1) is trivial


def init_params():
    """Deterministic parameter init mimicking the PyTorch module's shapes."""
    key = jax.random.PRNGKey(0)
    ks = jax.random.split(key, 8)

    def torch_linear(kw, kb, fan_in, fan_out):
        # PyTorch default Linear init: U(-1/sqrt(fan_in), 1/sqrt(fan_in))
        bound = 1.0 / jnp.sqrt(fan_in)
        w = jax.random.uniform(kw, (fan_in, fan_out), jnp.float32, -bound, bound)
        b = jax.random.uniform(kb, (1, fan_out), jnp.float32, -bound, bound)
        return w, b

    def xavier_linear(kw, kb, fan_in, fan_out):
        # nn.init.xavier_uniform_ on weight; bias keeps default init
        limit = jnp.sqrt(6.0 / (fan_in + fan_out))
        w = jax.random.uniform(kw, (fan_in, fan_out), jnp.float32, -limit, limit)
        bound = 1.0 / jnp.sqrt(fan_in)
        b = jax.random.uniform(kb, (1, fan_out), jnp.float32, -bound, bound)
        return w, b

    w1, b1 = torch_linear(ks[0], ks[1], 8, 64)    # hidden_layers[0]
    w2, b2 = torch_linear(ks[2], ks[3], 64, 32)   # hidden_layers[2]
    wa, ba = xavier_linear(ks[4], ks[5], 32, 16)  # adjust_layer
    wc, bc = torch_linear(ks[6], ks[7], 16, 1)    # classifier[0]
    return ((w1, b1), (w2, b2), (wa, ba), (wc, bc))


def reference_forward(x, params):
    (w1, b1), (w2, b2), (wa, ba), (wc, bc) = params
    h = jnp.maximum(x @ w1 + b1, 0.0)
    h = jnp.maximum(h @ w2 + b2, 0.0)
    h = h @ wa + ba
    return h @ wc + bc


if __name__ == "__main__":
    params = init_params()
    key = jax.random.PRNGKey(0)

    # Small batch: single grid step, blocks larger than the arrays (padded reads,
    # masked output writeback).
    x_small = jax.random.normal(jax.random.fold_in(key, 1), (8, 8), jnp.float32)
    out_small = jax.block_until_ready(xaint_forward(x_small, params))
    ref_small = reference_forward(x_small, params)
    assert out_small.shape == (8, 1), out_small.shape
    assert jnp.allclose(out_small, ref_small, atol=1e-4, rtol=1e-4), \
        "mismatch vs reference (small batch)"

    # Ragged larger batch with a small tile: multiple grid steps, VMEM-resident
    # weights, ragged-tail block (300 = 2*128 + 44) masked by Pallas.
    x_big = jax.random.normal(jax.random.fold_in(key, 2), (300, 8), jnp.float32)
    out_big = jax.block_until_ready(xaint_forward(x_big, params, tb=128))
    ref_big = reference_forward(x_big, params)
    assert out_big.shape == (300, 1), out_big.shape
    assert jnp.allclose(out_big, ref_big, atol=1e-4, rtol=1e-4), \
        "mismatch vs reference (tiled batch)"

    # Optional bf16 streaming path (halves x's HBM traffic, f32 accumulation);
    # loose tolerance vs the f32 reference.
    out_bf16 = jax.block_until_ready(
        xaint_forward(x_big, params, tb=128, stream_dtype=jnp.bfloat16))
    assert out_bf16.shape == (300, 1), out_bf16.shape
    assert jnp.allclose(out_bf16, ref_big, atol=5e-2, rtol=5e-2), \
        "mismatch vs reference (bf16 streaming)"

    print("KERNEL_OK")
</pallas_src>

<mosaic_0001>
module attributes {stable_mosaic.version = 11 : i64} {
  func.func @xaint_kernel(%arg0: i32, %arg1: memref<128x8xf32, #tpu.memory_space<vmem>>, %arg2: memref<64x8xf32, #tpu.memory_space<vmem>>, %arg3: memref<64x1xf32, #tpu.memory_space<vmem>>, %arg4: memref<32x64xf32, #tpu.memory_space<vmem>>, %arg5: memref<32x1xf32, #tpu.memory_space<vmem>>, %arg6: memref<1x32xf32, #tpu.memory_space<vmem>>, %arg7: memref<1x1xf32, #tpu.memory_space<vmem>>, %arg8: memref<1x128xf32, #tpu.memory_space<vmem>>) attributes {dimension_semantics = [#tpu.dimension_semantics<parallel>], iteration_bounds = array<i64: 1>, scalar_prefetch = 0 : i64, scratch_operands = 0 : i64, tpu.core_type = #tpu.core_type<tc>, window_params = [{transform_indices = @transform_0, window_bounds = array<i64: 128, 8>}, {pipeline_mode = #tpu.pipeline_mode<synchronous>, transform_indices = @transform_1, window_bounds = array<i64: 64, 8>}, {pipeline_mode = #tpu.pipeline_mode<synchronous>, transform_indices = @transform_2, window_bounds = array<i64: 64, 1>}, {pipeline_mode = #tpu.pipeline_mode<synchronous>, transform_indices = @transform_3, window_bounds = array<i64: 32, 64>}, {pipeline_mode = #tpu.pipeline_mode<synchronous>, transform_indices = @transform_4, window_bounds = array<i64: 32, 1>}, {pipeline_mode = #tpu.pipeline_mode<synchronous>, transform_indices = @transform_5, window_bounds = array<i64: 1, 32>}, {pipeline_mode = #tpu.pipeline_mode<synchronous>, transform_indices = @transform_6, window_bounds = array<i64: 1, 1>}, {transform_indices = @transform_7, window_bounds = array<i64: 1, 128>}]} {
    %c0 = arith.constant 0 : index
    %c0_0 = arith.constant 0 : index
    %0 = vector.load %arg2[%c0, %c0_0] : memref<64x8xf32, #tpu.memory_space<vmem>>, vector<64x8xf32>
    %c0_1 = arith.constant 0 : index
    %c0_2 = arith.constant 0 : index
    %1 = vector.load %arg1[%c0_1, %c0_2] : memref<128x8xf32, #tpu.memory_space<vmem>>, vector<128x8xf32>
    %cst = arith.constant dense<0.000000e+00> : vector<64x128xf32>
    %2 = tpu.matmul %0, %1, %cst {dimension_numbers = #tpu.dot_dimension_numbers<[1], [1], [0], [0], [0, 0, 1, 0], [], []>} : vector<64x8xf32>, vector<128x8xf32>, vector<64x128xf32> -> vector<64x128xf32>
    %c0_3 = arith.constant 0 : index
    %c0_4 = arith.constant 0 : index
    %3 = vector.load %arg3[%c0_3, %c0_4] : memref<64x1xf32, #tpu.memory_space<vmem>>, vector<64x1xf32>
    %4 = vector.broadcast %3 : vector<64x1xf32> to vector<64x128xf32>
    %5 = arith.addf %2, %4 : vector<64x128xf32>
    %cst_5 = arith.constant 0.000000e+00 : f32
    %6 = vector.broadcast %cst_5 : f32 to vector<64x128xf32>
    %7 = arith.maximumf %5, %6 : vector<64x128xf32>
    %c0_6 = arith.constant 0 : index
    %c0_7 = arith.constant 0 : index
    %8 = vector.load %arg4[%c0_6, %c0_7] : memref<32x64xf32, #tpu.memory_space<vmem>>, vector<32x64xf32>
    %cst_8 = arith.constant dense<0.000000e+00> : vector<32x128xf32>
    %9 = tpu.matmul %8, %7, %cst_8 {dimension_numbers = #tpu.dot_dimension_numbers<[1], [0], [0], [1], [0, 0, 1, 1], [], []>} : vector<32x64xf32>, vector<64x128xf32>, vector<32x128xf32> -> vector<32x128xf32>
    %c0_9 = arith.constant 0 : index
    %c0_10 = arith.constant 0 : index
    %10 = vector.load %arg5[%c0_9, %c0_10] : memref<32x1xf32, #tpu.memory_space<vmem>>, vector<32x1xf32>
    %11 = vector.broadcast %10 : vector<32x1xf32> to vector<32x128xf32>
    %12 = arith.addf %9, %11 : vector<32x128xf32>
    %cst_11 = arith.constant 0.000000e+00 : f32
    %13 = vector.broadcast %cst_11 : f32 to vector<32x128xf32>
    %14 = arith.maximumf %12, %13 : vector<32x128xf32>
    %c0_12 = arith.constant 0 : index
    %c0_13 = arith.constant 0 : index
    %15 = vector.load %arg6[%c0_12, %c0_13] : memref<1x32xf32, #tpu.memory_space<vmem>>, vector<1x32xf32>
    %cst_14 = arith.constant dense<0.000000e+00> : vector<1x128xf32>
    %16 = tpu.matmul %15, %14, %cst_14 {dimension_numbers = #tpu.dot_dimension_numbers<[1], [0], [0], [1], [0, 0, 1, 1], [], []>} : vector<1x32xf32>, vector<32x128xf32>, vector<1x128xf32> -> vector<1x128xf32>
    %c0_15 = arith.constant 0 : index
    %c0_16 = arith.constant 0 : index
    %17 = vector.load %arg7[%c0_15, %c0_16] : memref<1x1xf32, #tpu.memory_space<vmem>>, vector<1x1xf32>
    %18 = vector.broadcast %17 : vector<1x1xf32> to vector<1x128xf32>
    %19 = arith.addf %16, %18 : vector<1x128xf32>
    %c0_17 = arith.constant 0 : index
    %c0_18 = arith.constant 0 : index
    %20 = vector.load %arg8[%c0_17, %c0_18] : memref<1x128xf32, #tpu.memory_space<vmem>>, vector<1x128xf32>
    tpu.vector_store %arg8[%c0_17, %c0_18], %19 {strides = array<i32>} : memref<1x128xf32, #tpu.memory_space<vmem>>, vector<1x128xf32>,
    return
  }
  func.func @transform_0(%arg0: i32) -> (i32, i32) {
    %c0_i32 = arith.constant 0 : i32
    %c0_i32_0 = arith.constant 0 : i32
    return %arg0, %c0_i32 : i32, i32
  }
  func.func @transform_1(%arg0: i32) -> (i32, i32) {
    %c0_i32 = arith.constant 0 : i32
    %c0_i32_0 = arith.constant 0 : i32
    %c0_i32_1 = arith.constant 0 : i32
    return %c0_i32, %c0_i32_0 : i32, i32
  }
  func.func @transform_2(%arg0: i32) -> (i32, i32) {
    %c0_i32 = arith.constant 0 : i32
    %c0_i32_0 = arith.constant 0 : i32
    %c0_i32_1 = arith.constant 0 : i32
    return %c0_i32, %c0_i32_0 : i32, i32
  }
  func.func @transform_3(%arg0: i32) -> (i32, i32) {
    %c0_i32 = arith.constant 0 : i32
    %c0_i32_0 = arith.constant 0 : i32
    %c0_i32_1 = arith.constant 0 : i32
    return %c0_i32, %c0_i32_0 : i32, i32
  }
  func.func @transform_4(%arg0: i32) -> (i32, i32) {
    %c0_i32 = arith.constant 0 : i32
    %c0_i32_0 = arith.constant 0 : i32
    %c0_i32_1 = arith.constant 0 : i32
    return %c0_i32, %c0_i32_0 : i32, i32
  }
  func.func @transform_5(%arg0: i32) -> (i32, i32) {
    %c0_i32 = arith.constant 0 : i32
    %c0_i32_0 = arith.constant 0 : i32
    %c0_i32_1 = arith.constant 0 : i32
    return %c0_i32, %c0_i32_0 : i32, i32
  }
  func.func @transform_6(%arg0: i32) -> (i32, i32) {
    %c0_i32 = arith.constant 0 : i32
    %c0_i32_0 = arith.constant 0 : i32
    %c0_i32_1 = arith.constant 0 : i32
    return %c0_i32, %c0_i32_0 : i32, i32
  }
  func.func @transform_7(%arg0: i32) -> (i32, i32) {
    %c0_i32 = arith.constant 0 : i32
    %c0_i32_0 = arith.constant 0 : i32
    return %c0_i32, %arg0 : i32, i32
  }
}

</mosaic_0001>

<bundles_post_ra>
// kernel: tpu_custom_call.1
= control target key start
LH: loop header
LB: loop body
LE: loop exit
PB: predicated region body
PF: predicated region fallthrough
CT: control target
= control target key end

     0   :  { %s665_s0 = inlined_call_operand.vmem [shape: f32[8,8], index: 0, kind: input, shape index: {}]   ;;  %s666_s1 = inlined_call_operand.vmem [shape: f32[64,8], index: 1, kind: input, shape index: {}]   ;;  %s667_s2 = inlined_call_operand.vmem [shape: f32[64,1], index: 2, kind: input, shape index: {}]   ;;  %s668_s3 = inlined_call_operand.vmem [shape: f32[32,64], index: 3, kind: input, shape index: {}]   ;;  %s669_s4 = inlined_call_operand.vmem [shape: f32[32,1], index: 4, kind: input, shape index: {}]   ;;  %s670_s5 = inlined_call_operand.vmem [shape: f32[1,32], index: 5, kind: input, shape index: {}]   ;;  %s671_s6 = inlined_call_operand.<no memory space> [shape: f32[1,1], index: 6, kind: input, shape index: {}]   ;;  %s672_s7 = inlined_call_operand.hbm [shape: f32[1,8], index: 7, kind: output, shape index: {}]  }
   0x1   :  { %v12_v0 = vstv %s671_s6 }
   0x2   :  { %13 = vst [vmem:[#allocation2] sm:$0x1] %v12_v0 }
   0x3   :  { %v52_v1 = vld [vmem:[%s665_s0 + $0x78] sm:$0xff]  ;;  %vm101_vm0 = vcmask 64512   ;;  %v51_v2 = vld [vmem:[%s665_s0 + $0x70] sm:$0xff] }
   0x4   :  { %375 = vmatpush.xpose.msk.msra.mxu2 %vm101_vm0, %v52_v1  ;;  %376 = vmatpush.xpose.msk.msra.mxu3 %vm101_vm0, %v52_v1 }
   0x5   :  { %346 = vmatpush.xpose.msk.msra.mxu0 %vm101_vm0, %v52_v1 }
   0x6   :  { %14 = vsyncpa [#allocation4], 0  ;;  %v50_v3 = vld [vmem:[%s665_s0 + $0x68] sm:$0xff]  ;;  %v49_v4 = vld [vmem:[%s665_s0 + $0x60] sm:$0xff]  ;;  %v438_v10 = vmov 0   ;;  %vm251_vm1 = vcmask 523264  }
   0x7   :  { %v48_v5 = vld [vmem:[%s665_s0 + $0x58] sm:$0xff]  ;;  %v47_v6 = vld [vmem:[%s665_s0 + $0x50] sm:$0xff]  ;;  %v46_v7 = vld [vmem:[%s665_s0 + $0x48] sm:$0xff]  ;;  %409 = vset.pattern.permute.xlu0 %v438_v10  ;;  %410 = vset.pattern.permute.xlu1 %v438_v10  ;;  %vm305_vm2 = vcmask 261120   ;;  %s439_s6 = smov [#allocation3]   ;;  %s337_s10 = sshll.u32 %s672_s7, 4  ;;  %s338_s10 = int_to_ptr.hbm [resolvable:$true] %s337_s10 }
   0x8   :  { %377 = vmatpush.xpose.msk.msra.mxu2 %vm101_vm0, %v51_v2  ;;  %378 = vmatpush.xpose.msk.msra.mxu3 %vm101_vm0, %v51_v2  ;;  %v45_v8 = vld [vmem:[%s665_s0 + $0x40] sm:$0xff]  ;;  %v44_v9 = vld [vmem:[%s665_s0 + $0x38] sm:$0xff]  ;;  %v43_v12 = vld [vmem:[%s665_s0 + $0x30] sm:$0xff]  ;;  %s335_s30 = sshll.u32 %s439_s6, 4  ;;  %s336_s30 = int_to_ptr.vmem [resolvable:$true] %s335_s30 }
   0x9   :  { %347 = vmatpush.xpose.msk.msra.mxu0 %vm101_vm0, %v51_v2  ;;  %411 = vset.pattern.permute.xlu2 %v438_v10  ;;  %v60_v11 = vld [vmem:[%s667_s2 + $0x38] sm:$0xff]  ;;  %v42_v13 = vld [vmem:[%s665_s0 + $0x28] sm:$0xff]  ;;  %v59_v14 = vld [vmem:[%s667_s2 + $0x30] sm:$0xff] }
   0xa   :  { %98 = vperm.xlu0 %409, %v60_v11   ;;  %v41_v15 = vld [vmem:[%s665_s0 + $0x20] sm:$0xff]  ;;  %v40_v16 = vld [vmem:[%s665_s0 + $0x18] sm:$0xff]  ;;  %v54_v17 = vld [vmem:[%s667_s2 + $0x8] sm:$0xff] }
   0xb   :  { %v58_v18 = vld [vmem:[%s667_s2 + $0x28] sm:$0xff]  ;;  %v39_v19 = vld [vmem:[%s665_s0 + $0x10] sm:$0xff]  ;;  %v57_v21 = vld [vmem:[%s667_s2 + $0x20] sm:$0xff] }
   0xc   :  { %379 = vmatpush.xpose.msk.msra.mxu2 %vm101_vm0, %v50_v3  ;;  %380 = vmatpush.xpose.msk.msra.mxu3 %vm101_vm0, %v50_v3  ;;  %v38_v20 = vld [vmem:[%s665_s0 + $0x8] sm:$0xff]  ;;  %v229_v22 = vld [vmem:[%s669_s4 + $0x10] sm:$0xff]  ;;  %v37_v23 = vld [vmem:[%s665_s0] sm:$0xff] }
   0xd   :  { %348 = vmatpush.xpose.msk.msra.mxu0 %vm101_vm0, %v50_v3  ;;  %88 = vperm.xlu1 %410, %v58_v18   ;;  %v30_v24 = vld [vmem:[%s666_s1 + $0x8] sm:$0xff]  ;;  %v35_v25 = vld [vmem:[%s666_s1 + $0x30] sm:$0xff]  ;;  %v29_v26 = vld [vmem:[%s666_s1] sm:$0xff] }
   0xe   :  { %v53_v27 = vld [vmem:[%s667_s2] sm:$0xff]  ;;  %v56_v29 = vld [vmem:[%s667_s2 + $0x18] sm:$0xff]  ;;  %v31_v30 = vld [vmem:[%s666_s1 + $0x10] sm:$0xff] }
   0xf   :  { %v298_v28 = vld [vmem:[#allocation2] sm:$0x1]  ;;  %78 = vperm.xlu2 %411, %v56_v29   ;;  %v36_v31 = vld [vmem:[%s666_s1 + $0x38] sm:$0xff]  ;;  %v55_v32 = vld [vmem:[%s667_s2 + $0x10] sm:$0xff] }
  0x10   :  { %381 = vmatpush.xpose.msk.msra.mxu2 %vm101_vm0, %v49_v4  ;;  %382 = vmatpush.xpose.msk.msra.mxu3 %vm101_vm0, %v49_v4  ;;  %v228_v33 = vld [vmem:[%s669_s4 + $0x8] sm:$0xff]  ;;  %v32_v34 = vld [vmem:[%s666_s1 + $0x18] sm:$0xff]  ;;  %v33_v36 = vld [vmem:[%s666_s1 + $0x20] sm:$0xff] }
  0x11   :  { %349 = vmatpush.xpose.msk.msra.mxu0 %vm101_vm0, %v49_v4  ;;  %v230_v35 = vld [vmem:[%s669_s4 + $0x18] sm:$0xff]  ;;  %v227_v37 = vld [vmem:[%s669_s4] sm:$0xff]  ;;  %v34_v38 = vld [vmem:[%s666_s1 + $0x28] sm:$0xff] }
  0x12   :  { %93 = vperm.xlu0 %409, %v59_v14   ;;  %v226_v10 = vld [vmem:[%s668_s3 + $0x18] sm:$0xff] }
  0x14   :  { %383 = vmatpush.xpose.msk.msra.mxu2 %vm101_vm0, %v48_v5  ;;  %384 = vmatpush.xpose.msk.msra.mxu3 %vm101_vm0, %v48_v5 }
  0x15   :  { %350 = vmatpush.xpose.msk.msra.mxu0 %vm101_vm0, %v48_v5  ;;  %83 = vperm.xlu1 %410, %v57_v21  }
  0x17   :  { %73 = vperm.xlu2 %411, %v55_v32  }
  0x18   :  { %385 = vmatpush.xpose.msk.msra.mxu2 %vm101_vm0, %v47_v6  ;;  %386 = vmatpush.xpose.msk.msra.mxu3 %vm101_vm0, %v47_v6 }
  0x19   :  { %351 = vmatpush.xpose.msk.msra.mxu0 %vm101_vm0, %v47_v6 }
  0x1a   :  { %68 = vperm.xlu0 %409, %v54_v17  }
  0x1c   :  { %387 = vmatpush.xpose.msk.msra.mxu2 %vm101_vm0, %v46_v7  ;;  %388 = vmatpush.xpose.msk.msra.mxu3 %vm101_vm0, %v46_v7 }
  0x1d   :  { %352 = vmatpush.xpose.msk.msra.mxu0 %vm101_vm0, %v46_v7  ;;  %63 = vperm.xlu1 %410, %v53_v27   ;;  %v223_v7 = vld [vmem:[%s668_s3] sm:$0xff] }
  0x1e   :  { %v297_v27 = vld [vmem:[%s670_s5] sm:$0x1] }
  0x1f   :  { %248 = vperm.xlu2 %411, %v230_v35  }
  0x20   :  { %389 = vmatpush.xpose.msk.msra.mxu2 %vm101_vm0, %v45_v8  ;;  %390 = vmatpush.xpose.msk.msra.mxu3 %vm101_vm0, %v45_v8 }
  0x21   :  { %353 = vmatpush.xpose.msk.msra.mxu0 %vm101_vm0, %v45_v8  ;;  %v224_v8 = vld [vmem:[%s668_s3 + $0x8] sm:$0xff] }
  0x22   :  { %243 = vperm.xlu0 %409, %v229_v22  }
  0x24   :  { %391 = vmatpush.xpose.msk.msra.mxu2 %vm101_vm0, %v44_v9  ;;  %392 = vmatpush.xpose.msk.msra.mxu3 %vm101_vm0, %v44_v9 }
  0x25   :  { %354 = vmatpush.xpose.msk.msra.mxu0 %vm101_vm0, %v44_v9  ;;  %238 = vperm.xlu1 %410, %v228_v33   ;;  %v225_v9 = vld [vmem:[%s668_s3 + $0x10] sm:$0xff] }
  0x27   :  { %233 = vperm.xlu2 %411, %v227_v37  }
  0x28   :  { %393 = vmatpush.xpose.msk.msra.mxu2 %vm101_vm0, %v43_v12  ;;  %394 = vmatpush.xpose.msk.msra.mxu3 %vm101_vm0, %v43_v12 }
  0x29   :  { %355 = vmatpush.xpose.msk.msra.mxu0 %vm101_vm0, %v43_v12 }
  0x2a   :  { %301 = vperm.xlu0 %409, %v298_v28  }
  0x2c   :  { %395 = vmatpush.xpose.msk.msra.mxu2 %vm101_vm0, %v42_v13  ;;  %396 = vmatpush.xpose.msk.msra.mxu3 %vm101_vm0, %v42_v13 }
  0x2d   :  { %356 = vmatpush.xpose.msk.msra.mxu0 %vm101_vm0, %v42_v13 }
  0x30   :  { %397 = vmatpush.xpose.msk.msra.mxu2 %vm101_vm0, %v41_v15  ;;  %398 = vmatpush.xpose.msk.msra.mxu3 %vm101_vm0, %v41_v15 }
  0x31   :  { %357 = vmatpush.xpose.msk.msra.mxu0 %vm101_vm0, %v41_v15 }
  0x34   :  { %399 = vmatpush.xpose.msk.msra.mxu2 %vm101_vm0, %v40_v16  ;;  %400 = vmatpush.xpose.msk.msra.mxu3 %vm101_vm0, %v40_v16 }
  0x35   :  { %358 = vmatpush.xpose.msk.msra.mxu0 %vm101_vm0, %v40_v16 }
  0x38   :  { %401 = vmatpush.xpose.msk.msra.mxu2 %vm101_vm0, %v39_v19  ;;  %402 = vmatpush.xpose.msk.msra.mxu3 %vm101_vm0, %v39_v19 }
  0x39   :  { %359 = vmatpush.xpose.msk.msra.mxu0 %vm101_vm0, %v39_v19 }
  0x3c   :  { %403 = vmatpush.xpose.msk.msra.mxu2 %vm101_vm0, %v38_v20  ;;  %404 = vmatpush.xpose.msk.msra.mxu3 %vm101_vm0, %v38_v20 }
  0x3d   :  { %360 = vmatpush.xpose.msk.msra.mxu0 %vm101_vm0, %v38_v20 }
  0x40   :  { %405 = vmatpush.xpose.msk.msra.mxu2 %vm101_vm0, %v37_v23  ;;  %406 = vmatpush.xpose.msk.msra.mxu3 %vm101_vm0, %v37_v23 }
  0x41   :  { %361 = vmatpush.xpose.msk.msra.mxu0 %vm101_vm0, %v37_v23 }
  0x43   :  { %363 = vmatmul.msk.f32.vlgmr.msra.gmra.mxu2 %vm101_vm0, %v30_v24  ;;  %368 = vmatmul.msk.f32.vlgmr.msra.gmra.mxu3 %vm101_vm0, %v35_v25 }
  0x44   :  { %362 = vmatmul.msk.f32.vlgmr.msra.gmra.mxu0 %vm101_vm0, %v29_v26 }
  0x4b   :  { %364 = vmatmul.msk.f32.gmra.mxu2 %vm101_vm0, %v31_v30  ;;  %369 = vmatmul.msk.f32.gmra.mxu3 %vm101_vm0, %v36_v31 }
  0x53   :  { %365 = vmatmul.msk.f32.gmra.mxu2 %vm101_vm0, %v32_v34 }
  0x5b   :  { %366 = vmatmul.msk.f32.gmra.mxu2 %vm101_vm0, %v33_v36 }
  0x63   :  { %367 = vmatmul.msk.f32.gmra.mxu2 %vm101_vm0, %v34_v38 }
  0x69   :  { %v79_v51 = vpop.permute.xlu2 %78 }
  0x71   :  { %v74_v57 = vpop.permute.xlu2 %73 }
  0x79   :  { %v249_v14 = vpop.permute.xlu2 %248 }
  0x7c   :  { %v99_v39 = vpop.permute.xlu0 %98 }
  0x7f   :  { %v89_v50 = vpop.permute.xlu1 %88 }
  0x81   :  { %v234_v22 = vpop.permute.xlu2 %233 }
  0x84   :  { %v94_v42 = vpop.permute.xlu0 %93 }
  0x87   :  { %v84_v53 = vpop.permute.xlu1 %83 }
  0x8c   :  { %v69_v60 = vpop.permute.xlu0 %68 }
  0x8f   :  { %v64_v2 = vpop.permute.xlu1 %63 }
  0x94   :  { %v244_v15 = vpop.permute.xlu0 %243 }
  0x97   :  { %v239_v19 = vpop.permute.xlu1 %238 }
  0x9c   :  { %v302_v28 = vpop.permute.xlu0 %301 }
  0x9d   :  { %v304_v29 = vperm.slane %v302_v28, 0 }
  0xc1   :  { %v191_v63 = vpop.f32.mrf.mxu0 }
  0xc2   :  { %v192_v4 = vadd.f32 %v191_v63, %v64_v2 }
  0xc4   :  { %v215_v6 = vmax.f32 %v192_v4, 0.0 }
  0xc6   :  { %v194_v40 = vpop.f32.mrf.mxu2  ;;  %v209_v41 = vpop.f32.mrf.mxu3 }
  0xc7   :  { %v210_v43 = vadd.f32 %v209_v41, %v94_v42  ;;  %v195_v0 = vadd.f32 %v194_v40, %v69_v60 }
  0xc9   :  { %v221_v47 = vmax.f32 %v210_v43, 0.0  ;;  %v216_v5 = vmax.f32 %v195_v0, 0.0 }
  0xce   :  { %v197_v44 = vpop.f32.mrf.mxu2  ;;  %v212_v45 = vpop.f32.mrf.mxu3 }
  0xcf   :  { %v213_v46 = vadd.f32 %v212_v45, %v99_v39  ;;  %v198_v61 = vadd.f32 %v197_v44, %v74_v57 }
  0xd1   :  { %v222_v48 = vmax.f32 %v213_v46, 0.0  ;;  %v217_v3 = vmax.f32 %v198_v61, 0.0 }
  0xd3   :  { %272 = vmatpush.msra.mxu1 %v222_v48 }
  0xd5   :  { %273 = vmatpush.msra.mxu1 %v221_v47 }
  0xd6   :  { %v200_v49 = vpop.f32.mrf.mxu2 }
  0xd7   :  { %v201_v58 = vadd.f32 %v200_v49, %v79_v51 }
  0xd9   :  { %v218_v1 = vmax.f32 %v201_v58, 0.0 }
  0xde   :  { %v203_v52 = vpop.f32.mrf.mxu2 }
  0xdf   :  { %v204_v55 = vadd.f32 %v203_v52, %v84_v53 }
  0xe1   :  { %v219_v62 = vmax.f32 %v204_v55, 0.0 }
  0xe6   :  { %v206_v54 = vpop.f32.mrf.mxu2 }
  0xe7   :  { %v207_v56 = vadd.f32 %v206_v54, %v89_v50 }
  0xe9   :  { %v220_v59 = vmax.f32 %v207_v56, 0.0 }
  0xeb   :  { %274 = vmatpush.msra.mxu1 %v220_v59 }
  0xed   :  { %275 = vmatpush.msra.mxu1 %v219_v62 }
  0xef   :  { %276 = vmatpush.msra.mxu1 %v218_v1 }
  0xf1   :  { %277 = vmatpush.msra.mxu1 %v217_v3 }
  0xf3   :  { %278 = vmatpush.msra.mxu1 %v216_v5 }
  0xf5   :  { %279 = vmatpush.msra.mxu1 %v215_v6 }
  0xf6   :  { %370 = vmatmul.msk.f32.vlgmr.msra.gmra.mxu1 %vm251_vm1, %v223_v7 }
  0xfe   :  { %371 = vmatmul.msk.f32.gmra.mxu1 %vm251_vm1, %v224_v8 }
 0x106   :  { %372 = vmatmul.msk.f32.gmra.mxu1 %vm251_vm1, %v225_v9 }
 0x10e   :  { %373 = vmatmul.msk.f32.gmra.mxu1 %vm251_vm1, %v226_v10 }
 0x173   :  { %v281_v11 = vpop.f32.mrf.mxu1 }
 0x174   :  { %v282_v23 = vadd.f32 %v281_v11, %v234_v22 }
 0x176   :  { %v293_v26 = vmax.f32 %v282_v23, 0.0 }
 0x17b   :  { %v284_v12 = vpop.f32.mrf.mxu1 }
 0x17c   :  { %v285_v20 = vadd.f32 %v284_v12, %v239_v19 }
 0x17e   :  { %v294_v25 = vmax.f32 %v285_v20, 0.0 }
 0x183   :  { %v287_v13 = vpop.f32.mrf.mxu1 }
 0x184   :  { %v288_v17 = vadd.f32 %v287_v13, %v244_v15 }
 0x186   :  { %v295_v24 = vmax.f32 %v288_v17, 0.0 }
 0x18b   :  { %v290_v16 = vpop.f32.mrf.mxu1 }
 0x18c   :  { %v291_v18 = vadd.f32 %v290_v16, %v249_v14 }
 0x18e   :  { %v296_v21 = vmax.f32 %v291_v18, 0.0 }
 0x190   :  { %321 = vmatpush.msrb.mxu1 %v296_v21 }
 0x192   :  { %322 = vmatpush.msrb.mxu1 %v295_v24 }
 0x194   :  { %323 = vmatpush.msrb.mxu1 %v294_v25 }
 0x196   :  { %324 = vmatpush.msrb.mxu1 %v293_v26 }
 0x197   :  { %374 = vmatmul.msk.f32.vlgmr.msrb.gmra.mxu1 %vm305_vm2, %v297_v27 }
 0x214   :  { %v326_v30 = vpop.f32.mrf.mxu1 }
 0x215   :  { %v327_v31 = vadd.f32 %v326_v30, %v304_v29 }
 0x217   :  { %329 = vst [vmem:[#allocation3] sm:$0x1] %v327_v31 }
 0x218   :  { %340 = dma.vmem_to_hbm [thread:$0]  %s336_s30, 16, %s338_s10, [#allocation4]  }
 0x219   :  { %436 = dma.done.wait [#allocation4], 16  }
 0x21a   :  { %437 = vsyncadd [#allocation4], 4294967280 }
 0x21b   :  { %345 = vsyncpa [#allocation4], 1 }

</bundles_post_ra>
